<compile_context>
chip_gen: v5e
topology: v5e:2x2
jax: 0.10.0
libtpu: 0.0.40
codegen_flags: <defaults>
</compile_context>

<pallas_src>
import math

import jax
import jax.numpy as jnp
from jax.experimental import pallas as pl
from jax.experimental.pallas import tpu as pltpu


def _sinusoidal_kernel(t_ref, f_ref, out_ref):
    # t_ref:   (TB, 1)        f32  per-tile timesteps
    # f_ref:   (1, half_dim)  f32  precomputed frequencies (same block each step)
    # out_ref: (TB, dim)
    args = t_ref[...] * f_ref[...]                                   # (TB, half_dim)
    emb = jnp.concatenate([jnp.sin(args), jnp.cos(args)], axis=-1)   # (TB, dim)
    out_ref[...] = emb.astype(out_ref.dtype)                         # single lane-dense store


def sinusoidal_position_embeddings(time, dim, *, block_b=512, out_dtype=jnp.float32):
    """Pallas TPU equivalent of SinusoidalPositionEmbeddings(dim).forward(time).

    time: (B,) float array of timesteps
    returns: (B, dim) array (default float32)
    """
    if dim % 2 != 0 or dim < 4:
        raise ValueError("dim must be even and >= 4")
    half_dim = dim // 2

    time = jnp.asarray(time, jnp.float32)
    b = time.shape[0]

    # Hoisted: freqs computed once in the wrapper, not per grid step.
    scale = math.log(10000.0) / (half_dim - 1)
    freqs = jnp.exp(jnp.arange(half_dim, dtype=jnp.float32) * -scale).reshape(1, half_dim)

    # Batch tile: largest power-of-two-ish row tile up to block_b (multiple of 8).
    tb = min(block_b, max(8, pl.next_power_of_2(b)))
    b_pad = pl.cdiv(b, tb) * tb
    if b_pad == b:
        t2d = time.reshape(b, 1)
    else:
        t2d = jnp.zeros((b_pad, 1), jnp.float32).at[:b, 0].set(time)

    out_bytes = b_pad * dim * jnp.dtype(out_dtype).itemsize
    out = pl.pallas_call(
        _sinusoidal_kernel,
        out_shape=jax.ShapeDtypeStruct((b_pad, dim), out_dtype),
        grid_spec=pltpu.PrefetchScalarGridSpec(
            num_scalar_prefetch=0,
            grid=(b_pad // tb,),
            in_specs=[
                pl.BlockSpec((tb, 1), lambda i: (i, 0)),          # timesteps tile
                pl.BlockSpec((1, half_dim), lambda i: (0, 0)),    # shared freqs
            ],
            out_specs=pl.BlockSpec((tb, dim), lambda i: (i, 0)),
        ),
        compiler_params=pltpu.CompilerParams(
            dimension_semantics=("parallel",),
            vmem_limit_bytes=64 << 20,
        ),
        cost_estimate=pl.CostEstimate(
            flops=2 * b_pad * half_dim,
            transcendentals=b_pad * dim,
            bytes_accessed=b_pad * 4 + half_dim * 4 + out_bytes,
        ),
    )(t2d, freqs)
    return out[:b]


def _reference(time, dim):
    half_dim = dim // 2
    emb = math.log(10000.0) / (half_dim - 1)
    freqs = jnp.exp(jnp.arange(half_dim, dtype=jnp.float32) * -emb)
    args = time[:, None] * freqs[None, :]
    return jnp.concatenate([jnp.sin(args), jnp.cos(args)], axis=-1)


if __name__ == "__main__":
    key = jax.random.PRNGKey(0)
    B, DIM = 8, 32
    # "time" in diffusion models is a batch of timesteps
    time = jax.random.uniform(key, (B,), dtype=jnp.float32, minval=0.0, maxval=1000.0)

    out = sinusoidal_position_embeddings(time, DIM)
    out = jax.block_until_ready(out)

    ref = _reference(time, DIM)
    assert out.shape == (B, DIM)
    assert jnp.allclose(out, ref, atol=1e-5, rtol=1e-5)

    print("KERNEL_OK")
</pallas_src>

<mosaic_0001>
module attributes {stable_mosaic.version = 11 : i64} {
  func.func @_sinusoidal_kernel(%arg0: i32, %arg1: memref<8x1xf32, #tpu.memory_space<vmem>>, %arg2: memref<1x16xf32, #tpu.memory_space<vmem>>, %arg3: memref<8x32xf32, #tpu.memory_space<vmem>>) attributes {dimension_semantics = [#tpu.dimension_semantics<parallel>], iteration_bounds = array<i64: 1>, scalar_prefetch = 0 : i64, scratch_operands = 0 : i64, tpu.core_type = #tpu.core_type<tc>, window_params = [{transform_indices = @transform_0, window_bounds = array<i64: 8, 1>}, {pipeline_mode = #tpu.pipeline_mode<synchronous>, transform_indices = @transform_1, window_bounds = array<i64: 1, 16>}, {transform_indices = @transform_2, window_bounds = array<i64: 8, 32>}]} {
    %c0 = arith.constant 0 : index
    %c0_0 = arith.constant 0 : index
    %0 = vector.load %arg1[%c0, %c0_0] : memref<8x1xf32, #tpu.memory_space<vmem>>, vector<8x1xf32>
    %c0_1 = arith.constant 0 : index
    %c0_2 = arith.constant 0 : index
    %1 = vector.load %arg2[%c0_1, %c0_2] : memref<1x16xf32, #tpu.memory_space<vmem>>, vector<1x16xf32>
    %2 = vector.broadcast %0 : vector<8x1xf32> to vector<8x16xf32>
    %3 = vector.broadcast %1 : vector<1x16xf32> to vector<8x16xf32>
    %4 = arith.mulf %2, %3 : vector<8x16xf32>
    %5 = math.sin %4 : vector<8x16xf32>
    %6 = math.cos %4 : vector<8x16xf32>
    %7 = tpu.concatenate %5, %6 in 1 : vector<8x16xf32>, vector<8x16xf32> -> vector<8x32xf32>
    %c0_3 = arith.constant 0 : index
    %c0_4 = arith.constant 0 : index
    %8 = vector.load %arg3[%c0_3, %c0_4] : memref<8x32xf32, #tpu.memory_space<vmem>>, vector<8x32xf32>
    tpu.vector_store %arg3[%c0_3, %c0_4], %7 {strides = array<i32>} : memref<8x32xf32, #tpu.memory_space<vmem>>, vector<8x32xf32>,
    return
  }
  func.func @transform_0(%arg0: i32) -> (i32, i32) {
    %c0_i32 = arith.constant 0 : i32
    %c0_i32_0 = arith.constant 0 : i32
    return %arg0, %c0_i32 : i32, i32
  }
  func.func @transform_1(%arg0: i32) -> (i32, i32) {
    %c0_i32 = arith.constant 0 : i32
    %c0_i32_0 = arith.constant 0 : i32
    %c0_i32_1 = arith.constant 0 : i32
    return %c0_i32, %c0_i32_0 : i32, i32
  }
  func.func @transform_2(%arg0: i32) -> (i32, i32) {
    %c0_i32 = arith.constant 0 : i32
    %c0_i32_0 = arith.constant 0 : i32
    return %arg0, %c0_i32 : i32, i32
  }
}

</mosaic_0001>

<bundles_post_ra>
// kernel: tpu_custom_call.1
= control target key start
LH: loop header
LB: loop body
LE: loop exit
PB: predicated region body
PF: predicated region fallthrough
CT: control target
= control target key end

     0   :  { %v399_v1 = vmov 0   ;;  %s483_s0 = inlined_call_operand.vmem [shape: f32[8,1], index: 0, kind: input, shape index: {}]   ;;  %s484_s1 = inlined_call_operand.vmem [shape: f32[1,16], index: 1, kind: input, shape index: {}]   ;;  %s485_s2 = inlined_call_operand.hbm [shape: f32[8,32], index: 2, kind: output, shape index: {}]  }
   0x1   :  { %v12_v0 = vld [vmem:[%s483_s0] sm:$0xff]  ;;  %371 = vset.pattern.permute.xlu0 %v399_v1 }
   0x2   :  { %16 = vperm.xlu0 %371, %v12_v0  }
   0x3   :  { %7 = vsyncpa [#allocation3], 0  ;;  %v372_v2 = vld [vmem:[%s484_s1] ss:$0 sm:$0xff]  ;;  %v400_v16 = vmov 683565275  }
   0x4   :  { %v401_v18 = vmov 2475754826   ;;  %v402_v20 = vmov 2131351028   ;;  %v403_v22 = vmov 2102212464  }
   0x5   :  { %v404_v27 = vmov 920167782   ;;  %v405_v30 = vmov 1326507024   ;;  %s406_s0 = smov 16   ;;  %s407_s1 = smov [#allocation2]  }
   0x6   :  { %s345_s13 = sshll.u32 %s407_s1, 4  ;;  %s347_s16 = sshll.u32 %s485_s2, 4  ;;  %s346_s13 = int_to_ptr.vmem [resolvable:$true] %s345_s13  ;;  %s348_s16 = int_to_ptr.hbm [resolvable:$true] %s347_s16 }
  0x74   :  { %v17_v3 = vpop.permute.xlu0 %16 }
  0x75   :  { %v430_v4 = vmul.f32 %v372_v2, %v17_v3 }
  0x77   :  { %v26_v5 = vand.u32 2139095040, %v430_v4  ;;  %v23_v7 = vand.u32 2147483647, %v430_v4  ;;  %vm25_vm12 = vcmp.lt.s32.totalorder %v430_v4, 0 }
  0x79   :  { %v27_v6 = vshrl.u32 %v26_v5, 23  ;;  %v30_v10 = vand.u32 8388607, %v23_v7  ;;  %vm24_vm13 = vcmp.le.f32.partialorder %v23_v7, 0.7853982 }
  0x7b   :  { %v356_v8 = vadd.s32 4294967169, %v27_v6  ;;  %v31_v13 = vor.u32 8388608, %v30_v10 }
  0x7d   :  { %v33_v9 = vadd.s32 1, %v356_v8  ;;  %v438_v32 = vshll.u32 %v31_v13, 8 }
  0x7f   :  { %vm34_vm0 = vcmp.gt.s32.totalorder %v33_v9, 0  ;;  %v72_v44 = vand.u32 65535, %v438_v32  ;;  %v73_v46 = vshrl.u32 %v438_v32, 16 }
  0x80   :  { %v35_v11 = vsel %vm34_vm0, %v33_v9, 0 }
  0x81   :  { %v37_v12 = vand.u32 31, %v35_v11  ;;  %v436_v14 = vshrl.u32 %v35_v11, 5 }
  0x83   :  { %v38_v15 = vsub.s32 32, %v37_v12  ;;  %v40_v17 = vshll.u32 %v400_v16, %v37_v12  ;;  %v43_v19 = vshll.u32 %v401_v18, %v37_v12  ;;  %v46_v21 = vshll.u32 %v402_v20, %v37_v12 }
  0x84   :  { %v49_v23 = vshll.u32 %v403_v22, %v37_v12  ;;  %v52_v29 = vshll.u32 %v404_v27, %v37_v12  ;;  %vm55_vm1 = vcmp.lt.s32.totalorder %v436_v14, 1  ;;  %vm58_vm2 = vcmp.lt.s32.totalorder %v436_v14, 4 }
  0x85   :  { %v41_v24 = vshrl.u32 %v401_v18, %v38_v15  ;;  %v44_v25 = vshrl.u32 %v402_v20, %v38_v15  ;;  %v47_v26 = vshrl.u32 %v403_v22, %v38_v15  ;;  %v50_v28 = vshrl.u32 %v404_v27, %v38_v15 }
  0x86   :  { %v53_v31 = vshrl.u32 %v405_v30, %v38_v15  ;;  %vm57_vm3 = vcmp.lt.s32.totalorder %v436_v14, 3  ;;  %vm56_vm4 = vcmp.lt.s32.totalorder %v436_v14, 2  ;;  %v39_v9 = vshrl.u32 %v400_v16, %v38_v15 }
  0x87   :  { %v42_v33 = vor.u32 %v41_v24, %v40_v17  ;;  %v45_v34 = vor.u32 %v44_v25, %v43_v19  ;;  %v48_v35 = vor.u32 %v47_v26, %v46_v21  ;;  %v51_v36 = vor.u32 %v50_v28, %v49_v23 }
  0x88   :  { %v54_v37 = vor.u32 %v53_v31, %v52_v29 }
  0x89   :  { %v63_v38 = vsel %vm55_vm1, %v42_v33, %v45_v34  ;;  %v64_v39 = vsel %vm58_vm2, %v51_v36, 920167782  ;;  %v67_v40 = vsel %vm55_vm1, %v45_v34, %v48_v35  ;;  %v60_v5 = vsel %vm58_vm2, %v48_v35, 2102212464 }
  0x8a   :  { %v65_v41 = vsel %vm57_vm3, %v48_v35, %v64_v39  ;;  %v68_v42 = vsel %vm58_vm2, %v54_v37, 1326507024  ;;  %v59_v18 = vsel %vm55_vm1, %v39_v9, %v42_v33  ;;  %v61_v19 = vsel %vm57_vm3, %v45_v34, %v60_v5 }
  0x8b   :  { %v69_v43 = vsel %vm57_vm3, %v51_v36, %v68_v42  ;;  %v66_v45 = vsel %vm56_vm4, %v63_v38, %v65_v41  ;;  %v62_v16 = vsel %vm56_vm4, %v59_v18, %v61_v19 }
  0x8c   :  { %v70_v47 = vsel %vm56_vm4, %v67_v40, %v69_v43  ;;  %v96_v48 = vand.u32 65535, %v66_v45  ;;  %v97_v49 = vshrl.u32 %v66_v45, 16  ;;  %v116_v28 = vmul.u32 %v438_v32, %v62_v16 }
  0x8d   :  { %v74_v50 = vand.u32 65535, %v70_v47  ;;  %v75_v51 = vshrl.u32 %v70_v47, 16  ;;  %vm166_vm4 = vweird.f32 %v430_v4 }
  0x8e   :  { %v99_v52 = vmul.u32 %v97_v49, %v72_v44  ;;  %v100_v53 = vmul.u32 %v96_v48, %v73_v46  ;;  %v98_v56 = vmul.u32 %v96_v48, %v72_v44  ;;  %v101_v60 = vmul.u32 %v97_v49, %v73_v46 }
  0x8f   :  { %v77_v54 = vmul.u32 %v75_v51, %v72_v44  ;;  %v78_v55 = vmul.u32 %v74_v50, %v73_v46  ;;  %v76_v58 = vmul.u32 %v74_v50, %v72_v44  ;;  %v79_v61 = vmul.u32 %v75_v51, %v73_v46 }
  0x90   :  { %v102_v57 = vshll.u32 %v99_v52, 16  ;;  %v104_v62 = vshll.u32 %v100_v53, 16  ;;  %v103_v13 = vshrl.u32 %v99_v52, 16  ;;  %v105_v22 = vshrl.u32 %v100_v53, 16 }
  0x91   :  { %v80_v59 = vshll.u32 %v77_v54, 16  ;;  %v82_v0 = vshll.u32 %v78_v55, 16  ;;  %v81_v20 = vshrl.u32 %v77_v54, 16  ;;  %v83_v24 = vshrl.u32 %v78_v55, 16 }
  0x92   :  { %vm106_vm5 = vc.u32 %v98_v56, %v102_v57  ;;  %v108_v63 = vadd.s32 %v102_v57, %v98_v56 }
  0x93   :  { %vm84_vm6 = vc.u32 %v76_v58, %v80_v59  ;;  %v86_v2 = vadd.s32 %v80_v59, %v76_v58  ;;  %v107_v3 = vsel %vm106_vm5, 1, %v399_v1  ;;  %vm336_vm5 = vcmask 130048  }
  0x94   :  { %v85_v6 = vsel %vm84_vm6, 1, %v399_v1  ;;  %v109_v8 = vadd.s32 %v107_v3, %v101_v60  ;;  %vm110_vm7 = vc.u32 %v108_v63, %v104_v62  ;;  %vm338_vm6 = vcmask 261120  }
  0x95   :  { %v87_v10 = vadd.s32 %v85_v6, %v79_v61  ;;  %vm88_vm8 = vc.u32 %v86_v2, %v82_v0  ;;  %v111_v11 = vsel %vm110_vm7, 1, %v399_v1 }
  0x96   :  { %v89_v12 = vsel %vm88_vm8, 1, %v399_v1  ;;  %v113_v17 = vadd.s32 %v111_v11, %v109_v8  ;;  %v112_v1 = vadd.s32 %v108_v63, %v104_v62 }
  0x97   :  { %v91_v21 = vadd.s32 %v89_v12, %v87_v10 }
  0x98   :  { %v114_v23 = vadd.s32 %v113_v17, %v103_v13 }
  0x99   :  { %v92_v15 = vadd.s32 %v91_v21, %v81_v20 }
  0x9a   :  { %v115_v25 = vadd.s32 %v114_v23, %v105_v22 }
  0x9b   :  { %v93_v26 = vadd.s32 %v92_v15, %v83_v24 }
  0x9c   :  { %v119_v27 = vadd.s32 1, %v115_v25 }
  0x9d   :  { %vm118_vm9 = vc.u32 %v93_v26, %v112_v1  ;;  %v117_v40 = vadd.s32 %v112_v1, %v93_v26 }
  0x9e   :  { %v120_v29 = vsel %vm118_vm9, %v119_v27, %v115_v25 }
  0x9f   :  { %v121_v30 = vadd.s32 %v120_v29, %v116_v28 }
  0xa1   :  { %v122_v31 = vadd.s32 536870912, %v121_v30 }
  0xa3   :  { %v123_v33 = vshrl.u32 %v122_v31, 30 }
  0xa5   :  { %v124_v34 = vshll.u32 %v123_v33, 30  ;;  %v147_v52 = vsub.s32 4, %v123_v33 }
  0xa7   :  { %v125_v35 = vsub.s32 %v121_v30, %v124_v34  ;;  %v148_v56 = vsel %vm25_vm12, %v147_v52, %v123_v33 }
  0xa8   :  { %v150_v59 = vsel %vm24_vm13, 0, %v148_v56 }
  0xa9   :  { %vm126_vm10 = vcmp.lt.s32.totalorder %v125_v35, 0  ;;  %v127_v36 = vsub.s32 0, %v125_v35  ;;  %v167_v0 = vadd.s32 3, %v150_v59  ;;  %v322_v10 = vand.u32 3, %v150_v59 }
  0xab   :  { %v128_v37 = vsel %vm126_vm10, %v127_v36, %v125_v35  ;;  %v168_v8 = vand.u32 3, %v167_v0  ;;  %vm323_vm0 = vcmp.lt.s32.totalorder %v322_v10, 2  ;;  %vm324_vm1 = vcmp.eq.s32.totalorder %v322_v10, 0 }
  0xac   :  { %v129_v38 = vclz %v128_v37  ;;  %vm327_vm2 = vcmp.eq.s32.totalorder %v322_v10, 2 }
  0xad   :  { %vm173_vm14 = vcmp.eq.s32.totalorder %v168_v8, 2  ;;  %vm170_vm15 = vcmp.eq.s32.totalorder %v168_v8, 0  ;;  %vm169_vm3 = vcmp.lt.s32.totalorder %v168_v8, 2 }
  0xae   :  { %v357_v39 = vadd.s32 4294967294, %v129_v38 }
  0xb0   :  { %vm358_vm11 = vcmp.lt.s32.totalorder %v357_v39, 0 }
  0xb1   :  { %v132_v14 = vsel %vm358_vm11, 0, %v357_v39 }
  0xb2   :  { %v133_v41 = vsub.s32 32, %v132_v14  ;;  %v137_v42 = vsub.s32 4294967266, %v132_v14  ;;  %v134_v43 = vshll.u32 %v125_v35, %v132_v14 }
  0xb4   :  { %v135_v44 = vshrl.u32 %v117_v40, %v133_v41  ;;  %v138_v32 = vadd.s32 127, %v137_v42 }
  0xb6   :  { %v136_v45 = vor.u32 %v135_v44, %v134_v43  ;;  %v139_v46 = vshll.u32 %v138_v32, 23 }
  0xb8   :  { %v140_v47 = vor.u32 4788187, %v139_v46  ;;  %v143_v49 = vcvt.s32.f32 %v136_v45 }
  0xba   :  { %v141_v48 = vand.u32 2147483647, %v140_v47 }
  0xbc   :  { %v144_v50 = vmul.f32 %v143_v49, %v141_v48 }
  0xbe   :  { %v145_v51 = vxor.u32 2147483648, %v144_v50 }
  0xc0   :  { %v146_v53 = vsel %vm25_vm12, %v145_v51, %v144_v50 }
  0xc1   :  { %v149_v54 = vsel %vm24_vm13, %v430_v4, %v146_v53 }
  0xc2   :  { %v151_v55 = vmul.f32 %v149_v54, %v149_v54 }
  0xc4   :  { %v152_v57 = vmul.f32 -0.001358992, %v151_v55  ;;  %v159_v58 = vmul.f32 -0.00019511016, %v151_v55 }
  0xc6   :  { %v153_v60 = vadd.f32 0.041655596, %v152_v57  ;;  %v160_v61 = vadd.f32 0.008332121, %v159_v58 }
  0xc8   :  { %v154_v62 = vmul.f32 %v153_v60, %v151_v55  ;;  %v161_v63 = vmul.f32 %v160_v61, %v151_v55 }
  0xca   :  { %v155_v2 = vadd.f32 -0.4999988, %v154_v62  ;;  %v162_v3 = vadd.f32 -0.16666654, %v161_v63 }
  0xcc   :  { %v156_v5 = vmul.f32 %v155_v2, %v151_v55  ;;  %v163_v6 = vmul.f32 %v162_v3, %v151_v55 }
  0xce   :  { %v157_v9 = vadd.f32 1.0, %v156_v5  ;;  %v164_v7 = vadd.f32 1.0, %v163_v6 }
  0xd0   :  { %v165_v11 = vmul.f32 %v164_v7, %v149_v54  ;;  %v174_v12 = vxor.u32 2147483648, %v157_v9 }
  0xd2   :  { %v171_v13 = vxor.u32 2147483648, %v165_v11  ;;  %v175_v17 = vsel %vm173_vm14, %v174_v12, %v165_v11  ;;  %v329_v19 = vsel %vm327_vm2, %v174_v12, %v165_v11 }
  0xd4   :  { %v326_v18 = vsel %vm324_vm1, %v157_v9, %v171_v13  ;;  %v172_v20 = vsel %vm170_vm15, %v157_v9, %v171_v13 }
  0xd5   :  { %v330_v21 = vsel %vm323_vm0, %v326_v18, %v329_v19  ;;  %v176_v22 = vsel %vm169_vm3, %v172_v20, %v175_v17 }
  0xd6   :  { %v331_v23 = vsel %vm166_vm4, nan, %v330_v21  ;;  %v177_v24 = vsel %vm166_vm4, nan, %v176_v22 }
  0xd7   :  { %333 = vrot.lane.b32.xlu0 %v331_v23, %s406_s0 }
 0x149   :  { %v334_v15 = vpop.permute.xlu0 %333 }
 0x14a   :  { %v337_v16 = vsel %vm336_vm5, %v177_v24, %v334_v15 }
 0x14b   :  { %339 = vst.msk [vmem:[#allocation2] sm:$0xff] %vm338_vm6, %v337_v16 }
 0x14c   :  { %350 = dma.vmem_to_hbm [thread:$0]  %s346_s13, 128, %s348_s16, [#allocation3]  }
 0x14d   :  { %397 = dma.done.wait [#allocation3], 128  }
 0x14e   :  { %398 = vsyncadd [#allocation3], 4294967168 }
 0x14f   :  { %355 = vsyncpa [#allocation3], 1 }

</bundles_post_ra>
